<compile_context>
chip_gen: v7x
topology: tpu7x:2x2x1
jax: 0.10.0
libtpu: 0.0.40
codegen_flags: <defaults>
</compile_context>

<pallas_src>
import functools

import jax
import jax.numpy as jnp
from jax.experimental import pallas as pl
from jax.experimental.pallas import tpu as pltpu

D_IN = 768
D_BOT = 48
D_BOT_PAD = 128  # lane-dense padded bottleneck width


def adapter_kernel(x_ref, wd_ref, bd_ref, wu_ref, bu_ref, o_ref):
    # x_ref: (tm, 768)   wd_ref: (768, 128)  bd_ref: (1, 128) f32
    # wu_ref: (128, 768) bu_ref: (1, 768) f32  o_ref: (tm, 768)
    x = x_ref[...]
    h = jnp.dot(x, wd_ref[...], preferred_element_type=jnp.float32) + bd_ref[...]
    h = jnp.maximum(h, 0.0)  # ReLU
    y = (
        jnp.dot(h.astype(wu_ref.dtype), wu_ref[...], preferred_element_type=jnp.float32)
        + bu_ref[...]
    )
    o_ref[...] = y.astype(o_ref.dtype)


def prepare_adapter_params(w_down, b_down, w_up, b_up, *, weight_dtype=jnp.bfloat16):
    """Pad the bottleneck dim 48 -> 128 (zeros: numerics unchanged) and cast weights.

    Do this once at setup; it keeps the per-call HBM traffic to exactly
    x + out + one weight/bias fetch.
    """
    wd = jnp.pad(w_down, ((0, 0), (0, D_BOT_PAD - D_BOT))).astype(weight_dtype)
    bd = jnp.pad(b_down, (0, D_BOT_PAD - D_BOT)).astype(jnp.float32).reshape(1, D_BOT_PAD)
    wu = jnp.pad(w_up, ((0, D_BOT_PAD - D_BOT), (0, 0))).astype(weight_dtype)
    bu = b_up.astype(jnp.float32).reshape(1, D_IN)
    return wd, bd, wu, bu


def _round_up(v, m):
    return ((v + m - 1) // m) * m


def bottleneck_adapter_apply(params, x, *, io_dtype=jnp.bfloat16, tm=None):
    """x: (..., 768) -> (..., 768) = up(relu(down(x))), fused in one Pallas kernel.

    Weights are stored (in_features, out_features), so the kernel computes x @ W + b,
    matching nn.Linear(out, in) which does x @ W.T + b.
    """
    wd, bd, wu, bu = params
    orig_shape = x.shape
    x2 = x.reshape(-1, D_IN)
    if io_dtype is not None and x2.dtype != io_dtype:
        x2 = x2.astype(io_dtype)  # bf16 at the boundary: halves HBM bytes (mem-bound op)
    M = x2.shape[0]

    itemsize = jnp.dtype(x2.dtype).itemsize
    if tm is None:
        tm = 2048 if itemsize <= 2 else 1024

    # Row tile: multiple of 8 (sublane), and capped at ceil(M/2) rounded up to 8 so the
    # grid always has >= 2 steps (v7x has 2 TensorCores sharing the "parallel" axis).
    m_pad8 = _round_up(M, 8)
    half = _round_up(pl.cdiv(m_pad8, 2), 8)
    tm_eff = max(8, (min(tm, half) // 8) * 8)

    grid_m = pl.cdiv(M, tm_eff)  # Pallas masks the ragged tail block; rows independent.

    out = pl.pallas_call(
        adapter_kernel,
        out_shape=jax.ShapeDtypeStruct((M, D_IN), x2.dtype),
        grid_spec=pltpu.PrefetchScalarGridSpec(
            num_scalar_prefetch=0,
            grid=(grid_m,),
            in_specs=[
                pl.BlockSpec((tm_eff, D_IN), lambda i: (i, 0)),      # x rows
                pl.BlockSpec((D_IN, D_BOT_PAD), lambda i: (0, 0)),   # W_down (resident)
                pl.BlockSpec((1, D_BOT_PAD), lambda i: (0, 0)),      # b_down
                pl.BlockSpec((D_BOT_PAD, D_IN), lambda i: (0, 0)),   # W_up (resident)
                pl.BlockSpec((1, D_IN), lambda i: (0, 0)),           # b_up
            ],
            out_specs=pl.BlockSpec((tm_eff, D_IN), lambda i: (i, 0)),
        ),
        compiler_params=pltpu.CompilerParams(
            dimension_semantics=("parallel",),       # rows shard across v7x's 2 TCs
            vmem_limit_bytes=48 * 1024 * 1024,       # <= v7x 64 MiB physical; ample headroom
        ),
    )(x2, wd, bd, wu, bu)

    return out.reshape(orig_shape)


def bottleneck_adapter(x, w_down, b_down, w_up, b_up, *, io_dtype=jnp.bfloat16, tm=None):
    """Convenience wrapper: pad/cast weights then apply (prefer preparing params once)."""
    weight_dtype = io_dtype if io_dtype is not None else w_down.dtype
    params = prepare_adapter_params(w_down, b_down, w_up, b_up, weight_dtype=weight_dtype)
    return bottleneck_adapter_apply(params, x, io_dtype=io_dtype, tm=tm)


def _init_linear(key, fan_in, fan_out):
    # Deterministic init mimicking nn.Linear's uniform(-1/sqrt(fan_in), 1/sqrt(fan_in)).
    kw, kb = jax.random.split(key)
    bound = 1.0 / jnp.sqrt(float(fan_in))
    w = jax.random.uniform(kw, (fan_in, fan_out), jnp.float32, -bound, bound)
    b = jax.random.uniform(kb, (fan_out,), jnp.float32, -bound, bound)
    return w, b


if __name__ == "__main__":
    key = jax.random.PRNGKey(0)
    kx, kd, ku = jax.random.split(key, 3)

    B, S = 2, 8
    x = jax.random.normal(kx, (B, S, D_IN), jnp.float32)

    w_down, b_down = _init_linear(kd, D_IN, D_BOT)
    w_up, b_up = _init_linear(ku, D_BOT, D_IN)

    # Prepare (pad + cast) the weights once; jit with them closed over so XLA
    # constant-folds the padded copies.
    params = prepare_adapter_params(w_down, b_down, w_up, b_up)
    apply_fn = jax.jit(functools.partial(bottleneck_adapter_apply, params))

    y = jax.block_until_ready(apply_fn(x))

    # Pure-JAX f32 reference (same math as the PyTorch forward). Kernel runs with
    # bf16 activations/weights + f32 accumulation, so allow bf16-level tolerance.
    h_ref = jnp.maximum(x @ w_down + b_down, 0.0)
    y_ref = h_ref @ w_up + b_up
    assert y.shape == (B, S, D_IN)
    assert jnp.allclose(y.astype(jnp.float32), y_ref, atol=3e-2, rtol=3e-2)

    print("KERNEL_OK")
</pallas_src>

<mosaic_0001>
module attributes {stable_mosaic.version = 11 : i64} {
  func.func @adapter_kernel(%arg0: i32, %arg1: memref<8x768xbf16, #tpu.memory_space<vmem>>, %arg2: memref<768x128xbf16, #tpu.memory_space<vmem>>, %arg3: memref<1x128xf32, #tpu.memory_space<vmem>>, %arg4: memref<128x768xbf16, #tpu.memory_space<vmem>>, %arg5: memref<1x768xf32, #tpu.memory_space<vmem>>, %arg6: memref<8x768xbf16, #tpu.memory_space<vmem>>) attributes {dimension_semantics = [#tpu.dimension_semantics<parallel>], iteration_bounds = array<i64: 2>, scalar_prefetch = 0 : i64, scratch_operands = 0 : i64, tpu.core_type = #tpu.core_type<tc>, window_params = [{transform_indices = @transform_0, window_bounds = array<i64: 8, 768>}, {pipeline_mode = #tpu.pipeline_mode<synchronous>, transform_indices = @transform_1, window_bounds = array<i64: 768, 128>}, {pipeline_mode = #tpu.pipeline_mode<synchronous>, transform_indices = @transform_2, window_bounds = array<i64: 1, 128>}, {pipeline_mode = #tpu.pipeline_mode<synchronous>, transform_indices = @transform_3, window_bounds = array<i64: 128, 768>}, {pipeline_mode = #tpu.pipeline_mode<synchronous>, transform_indices = @transform_4, window_bounds = array<i64: 1, 768>}, {transform_indices = @transform_5, window_bounds = array<i64: 8, 768>}]} {
    %c0 = arith.constant 0 : index
    %c0_0 = arith.constant 0 : index
    %0 = vector.load %arg1[%c0, %c0_0] : memref<8x768xbf16, #tpu.memory_space<vmem>>, vector<8x768xbf16>
    %c0_1 = arith.constant 0 : index
    %c0_2 = arith.constant 0 : index
    %1 = vector.load %arg2[%c0_1, %c0_2] : memref<768x128xbf16, #tpu.memory_space<vmem>>, vector<768x128xbf16>
    %cst = arith.constant dense<0.000000e+00> : vector<8x128xf32>
    %2 = tpu.matmul %0, %1, %cst {dimension_numbers = #tpu.dot_dimension_numbers<[1], [0], [0], [1], [0, 0, 1, 1], [], []>} : vector<8x768xbf16>, vector<768x128xbf16>, vector<8x128xf32> -> vector<8x128xf32>
    %c0_3 = arith.constant 0 : index
    %c0_4 = arith.constant 0 : index
    %3 = vector.load %arg3[%c0_3, %c0_4] : memref<1x128xf32, #tpu.memory_space<vmem>>, vector<1x128xf32>
    %4 = vector.broadcast %3 : vector<1x128xf32> to vector<8x128xf32>
    %5 = arith.addf %2, %4 : vector<8x128xf32>
    %cst_5 = arith.constant 0.000000e+00 : f32
    %6 = vector.broadcast %cst_5 : f32 to vector<8x128xf32>
    %7 = arith.maximumf %5, %6 : vector<8x128xf32>
    %8 = arith.truncf %7 : vector<8x128xf32> to vector<8x128xbf16>
    %c0_6 = arith.constant 0 : index
    %c0_7 = arith.constant 0 : index
    %9 = vector.load %arg4[%c0_6, %c0_7] : memref<128x768xbf16, #tpu.memory_space<vmem>>, vector<128x768xbf16>
    %cst_8 = arith.constant dense<0.000000e+00> : vector<8x768xf32>
    %10 = tpu.matmul %8, %9, %cst_8 {dimension_numbers = #tpu.dot_dimension_numbers<[1], [0], [0], [1], [0, 0, 1, 1], [], []>} : vector<8x128xbf16>, vector<128x768xbf16>, vector<8x768xf32> -> vector<8x768xf32>
    %c0_9 = arith.constant 0 : index
    %c0_10 = arith.constant 0 : index
    %11 = vector.load %arg5[%c0_9, %c0_10] : memref<1x768xf32, #tpu.memory_space<vmem>>, vector<1x768xf32>
    %12 = vector.broadcast %11 : vector<1x768xf32> to vector<8x768xf32>
    %13 = arith.addf %10, %12 : vector<8x768xf32>
    %14 = arith.truncf %13 : vector<8x768xf32> to vector<8x768xbf16>
    %c0_11 = arith.constant 0 : index
    %c0_12 = arith.constant 0 : index
    %15 = vector.load %arg6[%c0_11, %c0_12] : memref<8x768xbf16, #tpu.memory_space<vmem>>, vector<8x768xbf16>
    tpu.vector_store %arg6[%c0_11, %c0_12], %14 {strides = array<i32>} : memref<8x768xbf16, #tpu.memory_space<vmem>>, vector<8x768xbf16>,
    return
  }
  func.func @transform_0(%arg0: i32) -> (i32, i32) {
    %c0_i32 = arith.constant 0 : i32
    %c0_i32_0 = arith.constant 0 : i32
    return %arg0, %c0_i32 : i32, i32
  }
  func.func @transform_1(%arg0: i32) -> (i32, i32) {
    %c0_i32 = arith.constant 0 : i32
    %c0_i32_0 = arith.constant 0 : i32
    %c0_i32_1 = arith.constant 0 : i32
    return %c0_i32, %c0_i32_0 : i32, i32
  }
  func.func @transform_2(%arg0: i32) -> (i32, i32) {
    %c0_i32 = arith.constant 0 : i32
    %c0_i32_0 = arith.constant 0 : i32
    %c0_i32_1 = arith.constant 0 : i32
    return %c0_i32, %c0_i32_0 : i32, i32
  }
  func.func @transform_3(%arg0: i32) -> (i32, i32) {
    %c0_i32 = arith.constant 0 : i32
    %c0_i32_0 = arith.constant 0 : i32
    %c0_i32_1 = arith.constant 0 : i32
    return %c0_i32, %c0_i32_0 : i32, i32
  }
  func.func @transform_4(%arg0: i32) -> (i32, i32) {
    %c0_i32 = arith.constant 0 : i32
    %c0_i32_0 = arith.constant 0 : i32
    %c0_i32_1 = arith.constant 0 : i32
    return %c0_i32, %c0_i32_0 : i32, i32
  }
  func.func @transform_5(%arg0: i32) -> (i32, i32) {
    %c0_i32 = arith.constant 0 : i32
    %c0_i32_0 = arith.constant 0 : i32
    return %arg0, %c0_i32 : i32, i32
  }
}

</mosaic_0001>

<bundles_post_ra>
// kernel: bottleneck_adapter_apply.1
= control target key start
LH: loop header
LB: loop body
LE: loop exit
PB: predicated region body
PF: predicated region fallthrough
CT: control target
= control target key end

     0   :  { %10 = vsyncpa [#allocation3], 0  ;;  %s2156_s0 = inlined_call_operand.vmem [shape: bf16[16,768], index: 0, kind: input, shape index: {}]   ;;  %s2157_s1 = inlined_call_operand.vmem [shape: bf16[768,128], index: 1, kind: input, shape index: {}]   ;;  %s2158_s2 = inlined_call_operand.vmem [shape: f32[1,128], index: 2, kind: input, shape index: {}]   ;;  %s2159_s3 = inlined_call_operand.vmem [shape: bf16[128,768], index: 3, kind: input, shape index: {}]   ;;  %s2160_s4 = inlined_call_operand.vmem [shape: f32[1,768], index: 4, kind: input, shape index: {}]   ;;  %s2161_s5 = inlined_call_operand.hbm [shape: bf16[16,768], index: 5, kind: output, shape index: {}]  }
   0x1   :  { %12 = vsyncpa [#allocation3 + $0x1], 0  ;;  %s1753_s18 = smov 0   ;;  %s1755_s19 = smov 0  }
   0x2   :  { %s1757_s20 = smov 0   ;;  %s1759_s21 = smov 0  }
   0x3 LB: > { %s1774_s22 = sadd.s32 4294967295, %s1719_s21   ;;  %s1305_s23 = sadd.s32 4294967294, %s1719_s21   ;;  %s1719_s21 = sphi %s1759_s21, %s2167_s21   ;;  %s1715_s20 = sphi %s1757_s20, %s2166_s20   ;;  %s1711_s19 = sphi %s1755_s19, %s2165_s19   ;;  %s1707_s18 = sphi %s1753_s18, %s2164_s18  }
   0x4   : > { %s1778_s24 = sadd.s32 1, %s1719_s21   ;;  %s135_s25 = sadd.s32 1, %s1715_s20 }
   0x5   : > { %s132_s26 = ssub.s32 %s1719_s21, %s1778_s24  ;;  %p145_p0 = scmp.ne.s32.totalorder %s1715_s20, %s1711_s19 }
   0x6   : > { %p133_p1 = scmp.eq.s32.totalorder %s132_s26, 0  ;;  %p146_p2 = scmp.eq.s32.totalorder %s1774_s22, 1 }
   0x7   : > { %p151_p3 = scmp.ne.s32.totalorder %s1711_s19, %s1707_s18  ;;  %p152_p4 = scmp.eq.s32.totalorder %s1305_s23, 1 }
   0x8   : > { %s1789_s27 = scalar_select %p133_p1, %s1715_s20, %s135_s25  }
   0x9   : > { %p1791_p5 = por %p146_p2, %p145_p0  ;;  %p1795_p6 = por %p152_p4, %p151_p3 }
   0xa   : > { %p1308_p7 = scmp.ge.s32.totalorder %s1719_s21, 1  ;;  %p190_p8 = scmp.lt.s32.totalorder %s1719_s21, 3 }
   0xc   : > { %p191_p9 = pnand %p1308_p7, %p190_p8 }
   0xd   : > { %v1531_v0 = vld [vmem:[%s2157_s1 + $0x40] sm:$0xff] (!%p191_p9)   ;;  %v1535_v4 = vld [vmem:[%s2157_s1 + $0x48] sm:$0xff] (!%p191_p9)   ;;  %v1539_v8 = vld [vmem:[%s2157_s1 + $0x50] sm:$0xff] (!%p191_p9)   ;;  %p218_p10 = scmp.lt.s32.totalorder (!%p191_p9), %s1774_s22, 1  ;;  %s215_s16 = sand.u32 (!%p191_p9), 1, %s1711_s19  }
   0xe   : > { %194 = sbr.rel (%p191_p9) target bundleno = 562 (0x232), region = 40  ;;  %v1532_v1 = vld [vmem:[%s2157_s1] sm:$0xff] (!%p191_p9)   ;;  %1422 = vmatprep.subr.bf16.mxu0 (!%p191_p9), %v1531_v0  ;;  %v1536_v5 = vld [vmem:[%s2157_s1 + $0x8] sm:$0xff] (!%p191_p9)   ;;  %v1540_v9 = vld [vmem:[%s2157_s1 + $0x10] sm:$0xff] (!%p191_p9)  }
   0xf   : > { %v1533_v2 = vld [vmem:[%s2157_s1 + $0xc0] sm:$0xff] (!%p191_p9)   ;;  %1423 = vmatpush3.bf16.msra.mxu0 (!%p191_p9), %v1532_v1  ;;  %v1537_v6 = vld [vmem:[%s2157_s1 + $0xc8] sm:$0xff] (!%p191_p9)   ;;  %v1541_v10 = vld [vmem:[%s2157_s1 + $0xd0] sm:$0xff] (!%p191_p9)   ;;  %s1488_s17 = smul.u32 (!%p191_p9), 24, %s215_s16 }
  0x10   : > { %v1534_v3 = vld [vmem:[%s2157_s1 + $0x80] sm:$0xff] (!%p191_p9)   ;;  %1444 = vmatprep.subr.bf16.mxu1 (!%p191_p9), %v1533_v2  ;;  %1424 = vmatprep.subr.bf16.mxu0 (!%p191_p9), %v1535_v4  ;;  %v1538_v7 = vld [vmem:[%s2157_s1 + $0x88] sm:$0xff] (!%p191_p9)   ;;  %v1542_v11 = vld [vmem:[%s2157_s1 + $0x90] sm:$0xff] (!%p191_p9)   ;;  %s1490_s23 = smul.u32 (!%p191_p9), 384, %s1774_s22 }
  0x11   : > { %1445 = vmatpush3.bf16.msra.mxu1 (!%p191_p9), %v1534_v3  ;;  %v1543_v12 = vld [vmem:[%s2157_s1 + $0x58] sm:$0xff] (!%p191_p9)   ;;  %v1547_v16 = vld [vmem:[%s2157_s1 + $0x60] sm:$0xff] (!%p191_p9)   ;;  %v1551_v20 = vld [vmem:[%s2157_s1 + $0x68] sm:$0xff] (!%p191_p9)  }
  0x12   : > { %1446 = vmatprep.subr.bf16.mxu1 (!%p191_p9), %v1537_v6  ;;  %v1544_v13 = vld [vmem:[%s2157_s1 + $0x18] sm:$0xff] (!%p191_p9)   ;;  %v1548_v17 = vld [vmem:[%s2157_s1 + $0x20] sm:$0xff] (!%p191_p9)   ;;  %v1552_v21 = vld [vmem:[%s2157_s1 + $0x28] sm:$0xff] (!%p191_p9)   ;;  %s2112_s7 = scalar_lea.hbm (!%p191_p9), %s2161_s5, %s1490_s23 }
  0x13   : > { %1425 = vmatpush3.bf16.msra.mxu0 (!%p191_p9), %v1536_v5  ;;  %v1545_v14 = vld [vmem:[%s2157_s1 + $0xd8] sm:$0xff] (!%p191_p9)   ;;  %v1549_v18 = vld [vmem:[%s2157_s1 + $0xe0] sm:$0xff] (!%p191_p9)   ;;  %v1553_v22 = vld [vmem:[%s2157_s1 + $0xe8] sm:$0xff] (!%p191_p9)  }
  0x14   : > { %1426 = vmatprep.subr.bf16.mxu0 (!%p191_p9), %v1539_v8  ;;  %v1546_v15 = vld [vmem:[%s2157_s1 + $0x98] sm:$0xff] (!%p191_p9)   ;;  %v1550_v19 = vld [vmem:[%s2157_s1 + $0xa0] sm:$0xff] (!%p191_p9)   ;;  %v1554_v23 = vld [vmem:[%s2157_s1 + $0xa8] sm:$0xff] (!%p191_p9)  }
  0x15   : > { %1447 = vmatpush3.bf16.msra.mxu1 %v1538_v7  ;;  %s219_s15 = scalar_select %p218_p10, %s1774_s22, 1  ;;  %v1555_v24 = vld [vmem:[%s2157_s1 + $0x70] sm:$0xff]   ;;  %v1559_v28 = vld [vmem:[%s2157_s1 + $0x78] sm:$0xff]   ;;  %v1565_v35 = vld [vmem:[%s2157_s1 + $0x140] sm:$0xff]  }
  0x16   : > { %1448 = vmatprep.subr.bf16.mxu1 %v1541_v10  ;;  %v1556_v25 = vld [vmem:[%s2157_s1 + $0x30] sm:$0xff]   ;;  %v1560_v29 = vld [vmem:[%s2157_s1 + $0x38] sm:$0xff]   ;;  %v1568_v39 = vld [vmem:[%s2157_s1 + $0x100] sm:$0xff]   ;;  %s1232_s22 = scalar_lea.sflag [#allocation3], %s215_s16 }
  0x17   : > { %1427 = vmatpush3.bf16.msra.mxu0 %v1540_v9  ;;  %s1489_s8 = smul.u32 24, %s219_s15  ;;  %v1557_v26 = vld [vmem:[%s2157_s1 + $0xf0] sm:$0xff]   ;;  %v1561_v30 = vld [vmem:[%s2157_s1 + $0xf8] sm:$0xff]   ;;  %v1569_v40 = vld [vmem:[%s2157_s1 + $0x148] sm:$0xff]   ;;  %s217_s15 = scalar_lea.vmem [#allocation2], %s1488_s17 }
  0x18   : > { %1428 = vmatprep.subr.bf16.mxu0 %v1543_v12  ;;  %v1558_v27 = vld [vmem:[%s2157_s1 + $0xb0] sm:$0xff]   ;;  %v1564_v34 = vld [vmem:[%s2157_s1 + $0xb8] sm:$0xff]   ;;  %v1570_v41 = vld [vmem:[%s2157_s1 + $0x108] sm:$0xff]   ;;  %s1246_s26 = sshll.u32 %s217_s15, 4  ;;  %s2114_s26 = int_to_ptr.vmem [resolvable:$true] %s1246_s26 }
  0x19   : > { %1449 = vmatpush3.bf16.msra.mxu1 %v1542_v11  ;;  %s1893_s25 = scalar_lea.vmem %s2156_s0, %s1489_s8  ;;  %v1571_v42 = vld [vmem:[%s2157_s1 + $0x150] sm:$0xff]   ;;  %v1573_v44 = vld [vmem:[%s2157_s1 + $0x158] sm:$0xff]   ;;  %v1575_v46 = vld [vmem:[%s2157_s1 + $0x160] sm:$0xff]   ;;  %s1657_s9 = scalar_lea.vmem %s2114_s26, 384 }
  0x1a   : > { %1450 = vmatprep.subr.bf16.mxu1 %v1545_v14  ;;  %v224_v31 = vld [vmem:[%s1893_s25] sm:$0xff]  ;;  %v225_v36 = vld [vmem:[%s1893_s25 + $0x8] sm:$0xff]  ;;  %v1572_v43 = vld [vmem:[%s2157_s1 + $0x110] sm:$0xff]   ;;  %p1658_p11 = scmp.ne.s32.totalorder %s2114_s26, %s1657_s9  ;;  %s1722_s8 = smov [#allocation2]  }
  0x1b   : > { %1429 = vmatpush3.bf16.msra.mxu0 %v1544_v13  ;;  %v1311_v32 = vcombine.low %v224_v31, %v224_v31  ;;  %v1312_v33 = vcombine.high %v224_v31, %v224_v31  ;;  %v1313_v37 = vcombine.low %v225_v36, %v225_v36  ;;  %v1314_v38 = vcombine.high %v225_v36, %v225_v36  ;;  %v1574_v45 = vld [vmem:[%s2157_s1 + $0x118] sm:$0xff]   ;;  %v1576_v47 = vld [vmem:[%s2157_s1 + $0x120] sm:$0xff]   ;;  %v1577_v48 = vld [vmem:[%s2157_s1 + $0x168] sm:$0xff]  }
  0x1c   : > { %1430 = vmatprep.subr.bf16.mxu0 %v1547_v16  ;;  %v226_v49 = vld [vmem:[%s1893_s25 + $0x10] sm:$0xff]  ;;  %v1578_v51 = vld [vmem:[%s2157_s1 + $0x128] sm:$0xff]   ;;  %v1581_v54 = vld [vmem:[%s2157_s1 + $0x178] sm:$0xff]   ;;  %p1659_p12 = pnand %p1658_p11, %p1791_p5  ;;  %s1661_s25 = sshll.u32 %s1722_s8, 4  ;;  %s1662_s25 = int_to_ptr.vmem [resolvable:$false] %s1661_s25 }
  0x1d   : > { %1451 = vmatpush3.bf16.msra.mxu1 %v1546_v15  ;;  %671 = vmatprep.mubr.bf16.mxu0 %v1312_v33  ;;  %v1316_v50 = vcombine.high %v226_v49, %v226_v49  ;;  %v1579_v52 = vld [vmem:[%s2157_s1 + $0x170] sm:$0xff]   ;;  %v1582_v55 = vld [vmem:[%s2157_s1 + $0x138] sm:$0xff]   ;;  %v1315_v56 = vcombine.low %v226_v49, %v226_v49  ;;  %v1588_v59 = vld [vmem:[%s2159_s3 + $0x8] ss:$24 sps:$4 sm:$0xff]   ;;  %s1663_s10 = scalar_lea.vmem %s1662_s25, 768  ;;  %p1664_p0 = scmp.lt.s32.totalorder %s2114_s26, %s1662_s25 }
  0x1e   : > { %1452 = vmatprep.subr.bf16.mxu1 %v1549_v18  ;;  %711 = vmatprep.mubr.bf16.mxu1 %v1314_v38  ;;  %v1580_v53 = vld [vmem:[%s2157_s1 + $0x130] sm:$0xff]   ;;  %v1585_v57 = vld [vmem:[%s2159_s3] ss:$24 sps:$4 sm:$0xff]   ;;  %v1587_v58 = vld [vmem:[%s2159_s3 + $0x4] ss:$24 sps:$4 sm:$0xff]   ;;  %p1660_p13 = pneg %p1659_p12  ;;  %p1665_p1 = scmp.lt.s32.totalorder %s1663_s10, %s1657_s9 }
  0x1f   : > { %1431 = vmatpush3.bf16.msra.mxu0 %v1548_v17  ;;  %v1590_v60 = vld [vmem:[%s2159_s3 + $0xc] ss:$24 sps:$4 sm:$0xff]   ;;  %v1596_v62 = vld [vmem:[%s2159_s3 + $0x3c] ss:$24 sps:$4 sm:$0xff]   ;;  %v1591_v63 = vld [vmem:[%s2159_s3 + $0x30] ss:$24 sps:$4 sm:$0xff]  }
  0x20   : > { %1432 = vmatprep.subr.bf16.mxu0 %v1551_v20  ;;  %v1593_v61 = vld [vmem:[%s2159_s3 + $0x34] ss:$24 sps:$4 sm:$0xff]   ;;  %v1594_v0 = vld [vmem:[%s2159_s3 + $0x38] ss:$24 sps:$4 sm:$0xff]   ;;  %v1599_v1 = vld [vmem:[%s2159_s3 + $0x64] ss:$24 sps:$4 sm:$0xff]   ;;  %p1666_p2 = por %p1665_p1, %p1664_p0 }
  0x21   : > { %1453 = vmatpush3.bf16.msra.mxu1 %v1550_v19  ;;  %v1602_v2 = vld [vmem:[%s2159_s3 + $0x6c] ss:$24 sps:$4 sm:$0xff]   ;;  %v1597_v3 = vld [vmem:[%s2159_s3 + $0x60] ss:$24 sps:$4 sm:$0xff]   ;;  %v1608_v6 = vld [vmem:[%s2159_s3 + $0x9c] ss:$24 sps:$4 sm:$0xff]  }
  0x22   : > { %1454 = vmatprep.subr.bf16.mxu1 %v1553_v22  ;;  %v1600_v4 = vld [vmem:[%s2159_s3 + $0x68] ss:$24 sps:$4 sm:$0xff]   ;;  %v1605_v5 = vld [vmem:[%s2159_s3 + $0x94] ss:$24 sps:$4 sm:$0xff]   ;;  %v1606_v8 = vld [vmem:[%s2159_s3 + $0x98] ss:$24 sps:$4 sm:$0xff]   ;;  %p1667_p3 = pnand %p1666_p2, %p1660_p13 }
  0x23   : > { %1433 = vmatpush3.bf16.msra.mxu0 %v1552_v21  ;;  %v1603_v7 = vld [vmem:[%s2159_s3 + $0x90] ss:$24 sps:$4 sm:$0xff]   ;;  %v1611_v9 = vld [vmem:[%s2159_s3 + $0xc4] ss:$24 sps:$4 sm:$0xff]   ;;  %v1609_v11 = vld [vmem:[%s2159_s3 + $0xc0] ss:$24 sps:$4 sm:$0xff]  }
  0x24   : > { %1434 = vmatprep.subr.bf16.mxu0 %v1555_v24  ;;  %v1614_v10 = vld [vmem:[%s2159_s3 + $0xcc] ss:$24 sps:$4 sm:$0xff]   ;;  %v1612_v12 = vld [vmem:[%s2159_s3 + $0xc8] ss:$24 sps:$4 sm:$0xff]   ;;  %v1620_v14 = vld [vmem:[%s2159_s3 + $0xfc] ss:$24 sps:$4 sm:$0xff]  }
  0x25   : > { %1455 = vmatpush3.bf16.msra.mxu1 %v1554_v23  ;;  %v1617_v13 = vld [vmem:[%s2159_s3 + $0xf4] ss:$24 sps:$4 sm:$0xff]   ;;  %v1615_v15 = vld [vmem:[%s2159_s3 + $0xf0] ss:$24 sps:$4 sm:$0xff]   ;;  %v1623_v17 = vld [vmem:[%s2159_s3 + $0x124] ss:$24 sps:$4 sm:$0xff]  }
  0x26   : > { %1456 = vmatprep.subr.bf16.mxu1 %v1557_v26  ;;  %v1618_v16 = vld [vmem:[%s2159_s3 + $0xf8] ss:$24 sps:$4 sm:$0xff]   ;;  %v1626_v19 = vld [vmem:[%s2159_s3 + $0x12c] ss:$24 sps:$4 sm:$0xff]   ;;  %v1624_v20 = vld [vmem:[%s2159_s3 + $0x128] ss:$24 sps:$4 sm:$0xff]  }
  0x27   : > { %1435 = vmatpush3.bf16.msra.mxu0 %v1556_v25  ;;  %v1621_v18 = vld [vmem:[%s2159_s3 + $0x120] ss:$24 sps:$4 sm:$0xff]   ;;  %v1629_v21 = vld [vmem:[%s2159_s3 + $0x154] ss:$24 sps:$4 sm:$0xff]   ;;  %v1627_v22 = vld [vmem:[%s2159_s3 + $0x150] ss:$24 sps:$4 sm:$0xff]  }
  0x28   : > { %1436 = vmatprep.subr.bf16.mxu0 %v1559_v28  ;;  %v1632_v23 = vld [vmem:[%s2159_s3 + $0x15c] ss:$24 sps:$4 sm:$0xff]   ;;  %v1630_v24 = vld [vmem:[%s2159_s3 + $0x158] ss:$24 sps:$4 sm:$0xff]   ;;  %v1721_v26 = vmov 0  }
  0x29   : > { %1457 = vmatpush3.bf16.msra.mxu1 %v1558_v27  ;;  %v1635_v25 = vld [vmem:[%s2159_s3 + $0x14] ss:$24 sps:$4 sm:$0xff]   ;;  %v1310_v28 = vld [vmem:[%s2158_s2] ss:$0 sm:$0xff]  ;;  %v1638_v49 = vld [vmem:[%s2159_s3 + $0x44] ss:$24 sps:$4 sm:$0xff]  }
  0x2a   : > { %1458 = vmatprep.subr.bf16.mxu1 %v1561_v30 }
  0x2b   : > { %1437 = vmatpush3.bf16.msra.mxu0 %v1560_v29 }
  0x2c   : > { %1466 = vmatprep.subr.bf16.mxu0 %v1565_v35 }
  0x2d   : > { %1459 = vmatpush3.bf16.msra.mxu1 %v1564_v34 }
  0x2e   : > { %672 = vmatmul.mubr.bf16.vlgmr.msra.gmra.mrb[0].mxu0 %v1311_v32  ;;  %1081 = vmatprep.subr.bf16.mxu1 %v1587_v58  ;;  %v1648_v58 = vld [vmem:[%s2159_s3 + $0x100] ss:$24 sps:$4 sm:$0xff]  }
  0x2f   : > { %1467 = vmatpush3.bf16.msra.mxu0 %v1568_v39  ;;  %751 = vmatprep.mubr.bf16.mxu0 %v1316_v50  ;;  %v1636_v50 = vld [vmem:[%s2159_s3 + $0x40] ss:$24 sps:$4 sm:$0xff]  }
  0x30   : > { %712 = vmatmul.mubr.bf16.vlgmr.msra.gmra.mrb[0].mxu1 %v1313_v37  ;;  %1468 = vmatprep.subr.bf16.mxu0 %v1569_v40 }
  0x31   : > { %1082 = vmatpush1.bf16.msra.mxu1 %v1585_v57  ;;  %1113 = vmatprep.mubr.bf16.mxu1 %v1721_v26  ;;  %v1650_v57 = vld [vmem:[%s2159_s3 + $0x104] ss:$24 sps:$4 sm:$0xff]  }
  0x32   : > { %1083 = vmatprep.subr.bf16.mxu1 %v1593_v61  ;;  %v1656_v61 = vld [vmem:[%s2159_s3 + $0x164] ss:$24 sps:$4 sm:$0xff]  }
  0x33   : > { %1469 = vmatpush3.bf16.msra.mxu0 %v1570_v41 }
  0x34   : > { %1470 = vmatprep.subr.bf16.mxu0 %v1571_v42 }
  0x35   : > { %1084 = vmatpush1.bf16.msra.mxu1 %v1591_v63  ;;  %v811_v63 = vlaneseq }
  0x36   : > { %1085 = vmatprep.subr.bf16.mxu1 %v1599_v1 }
  0x37   : > { %1471 = vmatpush3.bf16.msra.mxu0 %v1572_v43 }
  0x38   : > { %1472 = vmatprep.subr.bf16.mxu0 %v1573_v44 }
  0x39   : > { %1086 = vmatpush1.bf16.msra.mxu1 %v1597_v3  ;;  %v809_v3 = vld [vmem:[%s2160_s4] sm:$0x3f] }
  0x3a   : > { %1087 = vmatprep.subr.bf16.mxu1 %v1605_v5 }
  0x3b   : > { %1473 = vmatpush3.bf16.msra.mxu0 %v1574_v45 }
  0x3c   : > { %1474 = vmatprep.subr.bf16.mxu0 %v1575_v46 }
  0x3d   : > { %1088 = vmatpush1.bf16.msra.mxu1 %v1603_v7 }
  0x3e   : > { %1089 = vmatprep.subr.bf16.mxu1 %v1611_v9 }
  0x3f   : > { %1475 = vmatpush3.bf16.msra.mxu0 %v1576_v47  ;;  %v1633_v47 = vld [vmem:[%s2159_s3 + $0x10] ss:$24 sps:$4 sm:$0xff]  }
  0x40   : > { %1476 = vmatprep.subr.bf16.mxu0 %v1577_v48 }
  0x41   : > { %1090 = vmatpush1.bf16.msra.mxu1 %v1609_v11 }
  0x42   : > { %1091 = vmatprep.subr.bf16.mxu1 %v1617_v13 }
  0x43   : > { %1477 = vmatpush3.bf16.msra.mxu0 %v1578_v51  ;;  %v1641_v51 = vld [vmem:[%s2159_s3 + $0x74] ss:$24 sps:$4 sm:$0xff]  }
  0x44   : > { %1478 = vmatprep.subr.bf16.mxu0 %v1579_v52  ;;  %v1639_v52 = vld [vmem:[%s2159_s3 + $0x70] ss:$24 sps:$4 sm:$0xff]  }
  0x45   : > { %1092 = vmatpush1.bf16.msra.mxu1 %v1615_v15 }
  0x46   : > { %1093 = vmatprep.subr.bf16.mxu1 %v1623_v17 }
  0x47   : > { %1479 = vmatpush3.bf16.msra.mxu0 %v1580_v53  ;;  %v1644_v53 = vld [vmem:[%s2159_s3 + $0xa4] ss:$24 sps:$4 sm:$0xff]  }
  0x48   : > { %1480 = vmatprep.subr.bf16.mxu0 %v1581_v54  ;;  %v1642_v54 = vld [vmem:[%s2159_s3 + $0xa0] ss:$24 sps:$4 sm:$0xff]  }
  0x49   : > { %1094 = vmatpush1.bf16.msra.mxu1 %v1621_v18 }
  0x4a   : > { %1095 = vmatprep.subr.bf16.mxu1 %v1629_v21 }
  0x4b   : > { %1481 = vmatpush3.bf16.msra.mxu0 %v1582_v55  ;;  %v1647_v55 = vld [vmem:[%s2159_s3 + $0xd4] ss:$24 sps:$4 sm:$0xff]  }
  0x4c   : > { %1122 = vmatprep.subr.bf16.mxu0 %v1590_v60  ;;  %v1651_v60 = vld [vmem:[%s2159_s3 + $0x130] ss:$24 sps:$4 sm:$0xff]  }
  0x4d   : > { %1096 = vmatpush1.bf16.msra.mxu1 %v1627_v22 }
  0x4e   : > { %752 = vmatmul.mubr.bf16.vlgmr.msra.gmra.mrb[4].mxu0 %v1315_v56  ;;  %1163 = vmatprep.subr.bf16.mxu1 %v1635_v25  ;;  %v1645_v56 = vld [vmem:[%s2159_s3 + $0xd0] ss:$24 sps:$4 sm:$0xff]  }
  0x4f   : > { %1123 = vmatpush1.bf16.msra.mxu0 %v1588_v59  ;;  %1154 = vmatprep.mubr.bf16.mxu0 %v1721_v26  ;;  %v1653_v59 = vld [vmem:[%s2159_s3 + $0x134] ss:$24 sps:$4 sm:$0xff]  }
  0x50   : > { %1124 = vmatprep.subr.bf16.mxu0 %v1596_v62  ;;  %v1654_v62 = vld [vmem:[%s2159_s3 + $0x160] ss:$24 sps:$4 sm:$0xff]  }
  0x53   : > { %1125 = vmatpush1.bf16.msra.mxu0 %v1594_v0  ;;  %v812_v0 = vshrl.u32 %v811_v63, 7 }
  0x54   : > { %1126 = vmatprep.subr.bf16.mxu0 %v1602_v2 }
  0x55   : > { %v813_v1 = vsub.s32 0, %v812_v0  ;;  %v821_v2 = vsub.s32 2, %v812_v0  ;;  %v825_v5 = vsub.s32 3, %v812_v0  ;;  %v833_v25 = vsub.s32 5, %v812_v0 }
  0x57   : > { %1127 = vmatpush1.bf16.msra.mxu0 %v1600_v4  ;;  %v817_v4 = vsub.s32 1, %v812_v0  ;;  %v822_v7 = vrot.slane %v809_v3, %v821_v2  ;;  %v826_v9 = vrot.slane %v809_v3, %v825_v5 }
  0x58   : > { %1128 = vmatprep.subr.bf16.mxu0 %v1608_v6  ;;  %v814_v6 = vrot.slane %v809_v3, %v813_v1 }
  0x5b   : > { %1129 = vmatpush1.bf16.msra.mxu0 %v1606_v8  ;;  %v818_v8 = vrot.slane %v809_v3, %v817_v4 }
  0x5c   : > { %1130 = vmatprep.subr.bf16.mxu0 %v1614_v10 }
  0x5f   : > { %1131 = vmatpush1.bf16.msra.mxu0 %v1612_v12 }
  0x60   : > { %1132 = vmatprep.subr.bf16.mxu0 %v1620_v14 }
  0x63   : > { %1133 = vmatpush1.bf16.msra.mxu0 %v1618_v16 }
  0x64   : > { %1134 = vmatprep.subr.bf16.mxu0 %v1626_v19 }
  0x67   : > { %1135 = vmatpush1.bf16.msra.mxu0 %v1624_v20 }
  0x68   : > { %1136 = vmatprep.subr.bf16.mxu0 %v1632_v23 }
  0x6b   : > { %1137 = vmatpush1.bf16.msra.mxu0 %v1630_v24  ;;  %v829_v24 = vsub.s32 4, %v812_v0 }
 0x101   : > { %v1438_v27 = vpop.f32.mrb[0].mxu0 }
 0x102   : > { %v1439_v29 = vpop.f32.mrb[1].mxu0 }
 0x103   : > { %v1440_v30 = vadd.f32 %v1439_v29, %v1438_v27  ;;  %v1441_v31 = vpop.f32.mrb[2].mxu0  ;;  %v1460_v32 = vpop.f32.mrb[0].mxu1  ;;  %v834_v27 = vrot.slane %v809_v3, %v833_v25 }
 0x104   : > { %v1442_v33 = vpop.f32.mrb[3].mxu0  ;;  %v1461_v34 = vpop.f32.mrb[1].mxu1 }
 0x105   : > { %v674_v35 = vadd.f32 %v1440_v30, %v1310_v28  ;;  %v1462_v36 = vadd.f32 %v1461_v34, %v1460_v32  ;;  %v1463_v37 = vpop.f32.mrb[2].mxu1 }
 0x106   : > { %v1464_v38 = vpop.f32.mrb[3].mxu1 }
 0x107   : > { %v714_v39 = vadd.f32 %v1462_v36, %v674_v35 }
 0x121   : > { %v1482_v40 = vpop.f32.mrb[4].mxu0 }
 0x122   : > { %v1483_v41 = vpop.f32.mrb[5].mxu0 }
 0x123   : > { %v1484_v42 = vadd.f32 %v1483_v41, %v1482_v40  ;;  %v1485_v43 = vpop.f32.mrb[6].mxu0 }
 0x124   : > { %v1486_v44 = vpop.f32.mrb[7].mxu0 }
 0x125   : > { %v754_v45 = vadd.f32 %v1484_v42, %v714_v39 }
 0x127   : > { %v759_v46 = vmax.f32 %v754_v45, 0.0 }
 0x129   : > { %v760_v48 = vpack.c.bf16 %v759_v46, %v759_v46 }
 0x12b   : > { %1114 = vmatmul.mubr.bf16.vlgmr.msra.gmra.mrb[4].mxu1 %v760_v48  ;;  %1155 = vmatmul.mubr.bf16.vlgmr.msra.gmra.mrb[8].mxu0 %v760_v48 }
 0x12c   : > { %1164 = vmatpush1.bf16.msra.mxu1 %v1633_v47  ;;  %1195 = vmatprep.mubr.bf16.mxu1 %v1721_v26  ;;  %v830_v26 = vrot.slane %v809_v3, %v829_v24 }
 0x12d   : > { %1165 = vmatprep.subr.bf16.mxu1 %v1638_v49 }
 0x130   : > { %1166 = vmatpush1.bf16.msra.mxu1 %v1636_v50 }
 0x131   : > { %1167 = vmatprep.subr.bf16.mxu1 %v1641_v51 }
 0x134   : > { %1168 = vmatpush1.bf16.msra.mxu1 %v1639_v52 }
 0x135   : > { %1169 = vmatprep.subr.bf16.mxu1 %v1644_v53 }
 0x138   : > { %1170 = vmatpush1.bf16.msra.mxu1 %v1642_v54 }
 0x139   : > { %1171 = vmatprep.subr.bf16.mxu1 %v1647_v55 }
 0x13c   : > { %1172 = vmatpush1.bf16.msra.mxu1 %v1645_v56 }
 0x13d   : > { %1173 = vmatprep.subr.bf16.mxu1 %v1650_v57 }
 0x140   : > { %1174 = vmatpush1.bf16.msra.mxu1 %v1648_v58 }
 0x141   : > { %1175 = vmatprep.subr.bf16.mxu1 %v1653_v59 }
 0x144   : > { %1176 = vmatpush1.bf16.msra.mxu1 %v1651_v60 }
 0x145   : > { %1177 = vmatprep.subr.bf16.mxu1 %v1656_v61 }
 0x148   : > { %1178 = vmatpush1.bf16.msra.mxu1 %v1654_v62 }
 0x14b   : > { %1196 = vmatmul.mubr.bf16.vlgmr.msra.gmra.mrb[8].mxu1 %v760_v48 }
 0x1fe   : > { %v1115_v10 = vpop.f32.mrb[4].mxu1  ;;  %v1156_v11 = vpop.f32.mrb[8].mxu0 }
 0x1ff   : > { %v1116_v12 = vadd.f32 %v1115_v10, %v814_v6  ;;  %v1157_v13 = vadd.f32 %v1156_v11, %v822_v7  ;;  %v1117_v14 = vpop.f32.mrb[5].mxu1  ;;  %v1158_v15 = vpop.f32.mrb[9].mxu0 }
 0x200   : > { %v1118_v16 = vadd.f32 %v1117_v14, %v818_v8  ;;  %v1159_v17 = vadd.f32 %v1158_v15, %v826_v9  ;;  %v1119_v18 = vpop.f32.mrb[6].mxu1  ;;  %v1160_v19 = vpop.f32.mrb[10].mxu0 }
 0x201   : > { %v1120_v20 = vpop.f32.mrb[7].mxu1  ;;  %v1161_v21 = vpop.f32.mrb[11].mxu0 }
 0x202   : > { %v1419_v22 = vpack.c.bf16 %v1118_v16, %v1116_v12  ;;  %v1420_v23 = vpack.c.bf16 %v1159_v17, %v1157_v13 }
 0x204   : > { %1228 = vst [vmem:[%s217_s15] sm:$0xff] %v1419_v22  ;;  %1229 = vst [vmem:[%s217_s15 + $0x8] sm:$0xff] %v1420_v23 }
 0x21e   : > { %v1197_v28 = vpop.f32.mrb[8].mxu1 }
 0x21f   : > { %v1198_v29 = vadd.f32 %v1197_v28, %v830_v26  ;;  %v1199_v30 = vpop.f32.mrb[9].mxu1 }
 0x220   : > { %v1200_v31 = vadd.f32 %v1199_v30, %v834_v27  ;;  %v1201_v32 = vpop.f32.mrb[10].mxu1 }
 0x221   : > { %v1202_v33 = vpop.f32.mrb[11].mxu1 }
 0x222   : > { %v1421_v34 = vpack.c.bf16 %v1200_v31, %v1198_v29 }
 0x224   : > { %1230 = vst [vmem:[%s217_s15 + $0x10] sm:$0xff] %v1421_v34 }
 0x225   : > { %1670 = shalt.err (!%p1667_p3)
}
 0x226   : > { %s1671_s11 = scalar_lea.hbm %s2112_s7, 384  ;;  %s1675_s14 = scalar_lea.hbm %s2161_s5, 768 }
 0x227   : > { %p1672_p4 = scmp.ne.s32.totalorder %s2112_s7, %s1671_s11  ;;  %p1676_p9 = scmp.lt.u32.totalorder %s2112_s7, %s2161_s5 }
 0x228   : > { %p1677_p10 = scmp.lt.u32.totalorder %s1675_s14, %s1671_s11  ;;  %p1679_p12 = scmp.lt.u32.totalorder %s1671_s11, %s2112_s7 }
 0x229   : > { %p1673_p7 = pnand %p1672_p4, %p1791_p5 }
 0x22a   : > { %p1678_p11 = por %p1677_p10, %p1676_p9 }
 0x22b   : > { %p1674_p8 = pneg %p1673_p7 }
 0x22c   : > { %p1680_p13 = por %p1679_p12, %p1678_p11 }
 0x22e   : > { %p1681_p0 = pnand %p1680_p13, %p1674_p8 }
 0x230   : > { %1684 = shalt.err (!%p1681_p0)
}
 0x231   : > { %1491 = dma.vmem_to_hbm [thread:$0]  (%p1791_p5), %s2114_s26, 384, %s2112_s7, %s1232_s22  }
 0x232 PF: > { %p1497_p1 = scmp.ge.s32.totalorder %s1719_s21, 2  ;;  %s1258_s15 = sand.u32 1, %s1707_s18  }
 0x233   : > { %s1259_s23 = scalar_lea.sflag [#allocation3], %s1258_s15 }
 0x234   : > { %p1494_p2 = pnand %p1497_p1, %p1795_p6 }
 0x236   : > { %1702 = dma.done.wait (!%p1494_p2), %s1259_s23, 384  }
 0x237   : > { %1704 = vsyncadd (!%p1494_p2), %s1259_s23, 4294966912  ;;  %p15_p3 = scmp.ge.s32.totalorder %s1778_s24, 4   ;;  %s2164_s18 = smov %s1711_s19 }
 0x238   : > { %s2165_s19 = smov %s1715_s20  ;;  %s2166_s20 = smov %s1789_s27 }
 0x239   : > { %s2167_s21 = smov %s1778_s24  ;;  %17 = sbr.rel (!%p15_p3) target bundleno = 3 (0x3), region = 75 }
 0x240   :  { %1264 = vsyncpa [#allocation3], 1 }
 0x241   :  { %1266 = vsyncpa [#allocation3 + $0x1], 1 }

</bundles_post_ra>
